<compile_context>
chip_gen: v6e
topology: v6e:2x2x1
jax: 0.10.0
libtpu: 0.0.40
codegen_flags: <defaults>
</compile_context>

<pallas_src>
import functools

import jax
import jax.numpy as jnp
from jax.experimental import pallas as pl
from jax.experimental.pallas import tpu as pltpu

EPS = 1e-5  # nn.LayerNorm default


def _round_up(n, m):
    return ((n + m - 1) // m) * m


def _prenorm_kernel(x_ref, gamma_ref, beta_ref, w_ref, bias_ref, o_ref, *, inv_d):
    # x_ref: (TM, Dp) f32   gamma/beta/bias: (1, Dp) f32   w: (Dp, Dp) bf16
    x = x_ref[...]

    # --- LayerNorm over the true feature dim (padded cols are zero, so sums
    # are unaffected; divide by the true D, biased variance like torch). ---
    s = jnp.sum(x, axis=-1, keepdims=True)
    sq = jnp.sum(x * x, axis=-1, keepdims=True)
    mean = s * inv_d
    var = sq * inv_d - mean * mean
    inv = jax.lax.rsqrt(var + EPS)
    # gamma/beta are zero in padded cols -> y is zero there.
    y = (x - mean) * inv * gamma_ref[...] + beta_ref[...]

    # --- fn(x): Linear(dim, dim) on the bf16 MXU, f32 accumulation ---
    out = jnp.dot(y.astype(jnp.bfloat16), w_ref[...],
                  preferred_element_type=jnp.float32)
    out = out + bias_ref[...]

    o_ref[...] = out.astype(o_ref.dtype)


def prenorm(x, gamma, beta, w, bias, *, tm_max=512):
    """x: (B, S, D) -> (B, S, D).  LayerNorm(D) followed by Linear(D, D)."""
    B, S, D = x.shape
    R = B * S

    # Lane-dense feature dim (multiple of 128); row tile multiple of 8.
    Dp = _round_up(max(D, 128), 128)
    TM = min(tm_max, _round_up(R, 8))
    Rp = _round_up(R, TM)
    grid_m = Rp // TM

    x2 = jnp.pad(x.reshape(R, D).astype(jnp.float32),
                 ((0, Rp - R), (0, Dp - D)))
    gamma2 = jnp.pad(gamma.astype(jnp.float32).reshape(1, D),
                     ((0, 0), (0, Dp - D)))
    beta2 = jnp.pad(beta.astype(jnp.float32).reshape(1, D),
                    ((0, 0), (0, Dp - D)))
    bias2 = jnp.pad(bias.astype(jnp.float32).reshape(1, D),
                    ((0, 0), (0, Dp - D)))
    w2 = jnp.pad(w.astype(jnp.float32),
                 ((0, Dp - D), (0, Dp - D))).astype(jnp.bfloat16)

    kernel = functools.partial(_prenorm_kernel, inv_d=1.0 / D)

    out = pl.pallas_call(
        kernel,
        out_shape=jax.ShapeDtypeStruct((Rp, Dp), x.dtype),
        grid_spec=pltpu.PrefetchScalarGridSpec(
            num_scalar_prefetch=0,
            grid=(grid_m,),
            in_specs=[
                pl.BlockSpec((TM, Dp), lambda i: (i, 0)),   # x row tile
                pl.BlockSpec((1, Dp), lambda i: (0, 0)),    # gamma (resident)
                pl.BlockSpec((1, Dp), lambda i: (0, 0)),    # beta  (resident)
                pl.BlockSpec((Dp, Dp), lambda i: (0, 0)),   # fn weight (bf16, resident)
                pl.BlockSpec((1, Dp), lambda i: (0, 0)),    # fn bias (resident)
            ],
            out_specs=pl.BlockSpec((TM, Dp), lambda i: (i, 0)),
        ),
        compiler_params=pltpu.CompilerParams(
            dimension_semantics=("parallel",),
            vmem_limit_bytes=64 * 1024 * 1024,
        ),
    )(x2, gamma2, beta2, w2, bias2)

    return out[:R, :D].reshape(B, S, D).astype(x.dtype)


def prenorm_ref(x, gamma, beta, w, bias):
    """Pure-JAX (f32) reference for correctness checking."""
    xf = x.astype(jnp.float32)
    mean = jnp.mean(xf, axis=-1, keepdims=True)
    var = jnp.mean((xf - mean) ** 2, axis=-1, keepdims=True)
    xn = (xf - mean) * jax.lax.rsqrt(var + EPS)
    y = xn * gamma + beta
    return (y @ w + bias).astype(x.dtype)


if __name__ == "__main__":
    B, S, D = 2, 8, 32

    key = jax.random.PRNGKey(0)
    kx, kw = jax.random.split(key)

    x = jax.random.normal(kx, (B, S, D), dtype=jnp.float32)

    # Deterministic parameter init (synthetic; mirrors module __init__ shapes):
    # nn.LayerNorm(dim): weight = ones(dim), bias = zeros(dim)
    gamma = jnp.ones((D,), dtype=jnp.float32)
    beta = jnp.zeros((D,), dtype=jnp.float32)
    # fn = Linear(dim, dim)
    w = jax.random.normal(kw, (D, D), dtype=jnp.float32) * (1.0 / jnp.sqrt(D))
    bias = jnp.zeros((D,), dtype=jnp.float32)

    out = prenorm(x, gamma, beta, w, bias)
    jax.block_until_ready(out)

    ref = prenorm_ref(x, gamma, beta, w, bias)
    assert out.shape == (B, S, D)
    # bf16 MXU operands -> slightly looser tolerance than a pure-f32 matmul.
    assert jnp.allclose(out, ref, atol=2e-2, rtol=2e-2), "mismatch vs reference"

    print("KERNEL_OK")
</pallas_src>

<mosaic_0001>
module attributes {stable_mosaic.version = 11 : i64} {
  func.func @_prenorm_kernel(%arg0: i32, %arg1: memref<16x128xf32, #tpu.memory_space<vmem>>, %arg2: memref<1x128xf32, #tpu.memory_space<vmem>>, %arg3: memref<1x128xf32, #tpu.memory_space<vmem>>, %arg4: memref<128x128xbf16, #tpu.memory_space<vmem>>, %arg5: memref<1x128xf32, #tpu.memory_space<vmem>>, %arg6: memref<16x128xf32, #tpu.memory_space<vmem>>) attributes {dimension_semantics = [#tpu.dimension_semantics<parallel>], iteration_bounds = array<i64: 1>, scalar_prefetch = 0 : i64, scratch_operands = 0 : i64, tpu.core_type = #tpu.core_type<tc>, window_params = [{transform_indices = @transform_0, window_bounds = array<i64: 16, 128>}, {pipeline_mode = #tpu.pipeline_mode<synchronous>, transform_indices = @transform_1, window_bounds = array<i64: 1, 128>}, {pipeline_mode = #tpu.pipeline_mode<synchronous>, transform_indices = @transform_2, window_bounds = array<i64: 1, 128>}, {pipeline_mode = #tpu.pipeline_mode<synchronous>, transform_indices = @transform_3, window_bounds = array<i64: 128, 128>}, {pipeline_mode = #tpu.pipeline_mode<synchronous>, transform_indices = @transform_4, window_bounds = array<i64: 1, 128>}, {transform_indices = @transform_5, window_bounds = array<i64: 16, 128>}]} {
    %c0 = arith.constant 0 : index
    %c0_0 = arith.constant 0 : index
    %0 = vector.load %arg1[%c0, %c0_0] : memref<16x128xf32, #tpu.memory_space<vmem>>, vector<16x128xf32>
    %cst = arith.constant dense<0.000000e+00> : vector<16xf32>
    %1 = vector.multi_reduction <add>, %0, %cst [1] : vector<16x128xf32> to vector<16xf32>
    %2 = vector.shape_cast %1 : vector<16xf32> to vector<16x1xf32>
    %3 = arith.mulf %0, %0 : vector<16x128xf32>
    %cst_1 = arith.constant dense<0.000000e+00> : vector<16xf32>
    %4 = vector.multi_reduction <add>, %3, %cst_1 [1] : vector<16x128xf32> to vector<16xf32>
    %5 = vector.shape_cast %4 : vector<16xf32> to vector<16x1xf32>
    %cst_2 = arith.constant 3.125000e-02 : f32
    %6 = vector.broadcast %cst_2 : f32 to vector<16x1xf32>
    %7 = arith.mulf %2, %6 : vector<16x1xf32>
    %cst_3 = arith.constant 3.125000e-02 : f32
    %8 = vector.broadcast %cst_3 : f32 to vector<16x1xf32>
    %9 = arith.mulf %5, %8 : vector<16x1xf32>
    %10 = arith.mulf %7, %7 : vector<16x1xf32>
    %11 = arith.subf %9, %10 : vector<16x1xf32>
    %cst_4 = arith.constant 9.99999974E-6 : f32
    %12 = vector.broadcast %cst_4 : f32 to vector<16x1xf32>
    %13 = arith.addf %11, %12 : vector<16x1xf32>
    %14 = math.rsqrt %13 : vector<16x1xf32>
    %15 = vector.broadcast %7 : vector<16x1xf32> to vector<16x128xf32>
    %16 = arith.subf %0, %15 : vector<16x128xf32>
    %17 = vector.broadcast %14 : vector<16x1xf32> to vector<16x128xf32>
    %18 = arith.mulf %16, %17 : vector<16x128xf32>
    %c0_5 = arith.constant 0 : index
    %c0_6 = arith.constant 0 : index
    %19 = vector.load %arg2[%c0_5, %c0_6] : memref<1x128xf32, #tpu.memory_space<vmem>>, vector<1x128xf32>
    %20 = vector.broadcast %19 : vector<1x128xf32> to vector<16x128xf32>
    %21 = arith.mulf %18, %20 : vector<16x128xf32>
    %c0_7 = arith.constant 0 : index
    %c0_8 = arith.constant 0 : index
    %22 = vector.load %arg3[%c0_7, %c0_8] : memref<1x128xf32, #tpu.memory_space<vmem>>, vector<1x128xf32>
    %23 = vector.broadcast %22 : vector<1x128xf32> to vector<16x128xf32>
    %24 = arith.addf %21, %23 : vector<16x128xf32>
    %25 = arith.truncf %24 : vector<16x128xf32> to vector<16x128xbf16>
    %c0_9 = arith.constant 0 : index
    %c0_10 = arith.constant 0 : index
    %26 = vector.load %arg4[%c0_9, %c0_10] : memref<128x128xbf16, #tpu.memory_space<vmem>>, vector<128x128xbf16>
    %cst_11 = arith.constant dense<0.000000e+00> : vector<16x128xf32>
    %27 = tpu.matmul %25, %26, %cst_11 {dimension_numbers = #tpu.dot_dimension_numbers<[1], [0], [0], [1], [0, 0, 1, 1], [], []>} : vector<16x128xbf16>, vector<128x128xbf16>, vector<16x128xf32> -> vector<16x128xf32>
    %c0_12 = arith.constant 0 : index
    %c0_13 = arith.constant 0 : index
    %28 = vector.load %arg5[%c0_12, %c0_13] : memref<1x128xf32, #tpu.memory_space<vmem>>, vector<1x128xf32>
    %29 = vector.broadcast %28 : vector<1x128xf32> to vector<16x128xf32>
    %30 = arith.addf %27, %29 : vector<16x128xf32>
    %c0_14 = arith.constant 0 : index
    %c0_15 = arith.constant 0 : index
    %31 = vector.load %arg6[%c0_14, %c0_15] : memref<16x128xf32, #tpu.memory_space<vmem>>, vector<16x128xf32>
    tpu.vector_store %arg6[%c0_14, %c0_15], %30 {strides = array<i32>} : memref<16x128xf32, #tpu.memory_space<vmem>>, vector<16x128xf32>,
    return
  }
  func.func @transform_0(%arg0: i32) -> (i32, i32) {
    %c0_i32 = arith.constant 0 : i32
    %c0_i32_0 = arith.constant 0 : i32
    return %arg0, %c0_i32 : i32, i32
  }
  func.func @transform_1(%arg0: i32) -> (i32, i32) {
    %c0_i32 = arith.constant 0 : i32
    %c0_i32_0 = arith.constant 0 : i32
    %c0_i32_1 = arith.constant 0 : i32
    return %c0_i32, %c0_i32_0 : i32, i32
  }
  func.func @transform_2(%arg0: i32) -> (i32, i32) {
    %c0_i32 = arith.constant 0 : i32
    %c0_i32_0 = arith.constant 0 : i32
    %c0_i32_1 = arith.constant 0 : i32
    return %c0_i32, %c0_i32_0 : i32, i32
  }
  func.func @transform_3(%arg0: i32) -> (i32, i32) {
    %c0_i32 = arith.constant 0 : i32
    %c0_i32_0 = arith.constant 0 : i32
    %c0_i32_1 = arith.constant 0 : i32
    return %c0_i32, %c0_i32_0 : i32, i32
  }
  func.func @transform_4(%arg0: i32) -> (i32, i32) {
    %c0_i32 = arith.constant 0 : i32
    %c0_i32_0 = arith.constant 0 : i32
    %c0_i32_1 = arith.constant 0 : i32
    return %c0_i32, %c0_i32_0 : i32, i32
  }
  func.func @transform_5(%arg0: i32) -> (i32, i32) {
    %c0_i32 = arith.constant 0 : i32
    %c0_i32_0 = arith.constant 0 : i32
    return %arg0, %c0_i32 : i32, i32
  }
}

</mosaic_0001>

<bundles_post_ra>
// kernel: tpu_custom_call.1
= control target key start
LH: loop header
LB: loop body
LE: loop exit
PB: predicated region body
PF: predicated region fallthrough
CT: control target
= control target key end

     0   :  { %10 = vsyncpa [#allocation3], 0  ;;  %s419_s0 = inlined_call_operand.hbm [shape: f32[16,128], index: 0, kind: input, shape index: {}]   ;;  %s420_s1 = inlined_call_operand.vmem [shape: f32[1,128], index: 1, kind: input, shape index: {}]   ;;  %s421_s2 = inlined_call_operand.vmem [shape: f32[1,128], index: 2, kind: input, shape index: {}]   ;;  %s422_s3 = inlined_call_operand.hbm [shape: bf16[128,128], index: 3, kind: input, shape index: {}]   ;;  %s423_s4 = inlined_call_operand.vmem [shape: f32[1,128], index: 4, kind: input, shape index: {}]   ;;  %s424_s5 = inlined_call_operand.hbm [shape: f32[16,128], index: 5, kind: output, shape index: {}]  }
   0x1   :  { %11 = vsyncpa [#allocation6], 0 }
   0x2   :  { %12 = vsyncpa [#allocation4], 0  ;;  %s356_s18 = smov [#allocation2]  }
   0x3   :  { %s18_s19 = sshll.u32 %s356_s18, 4  ;;  %s19_s19 = int_to_ptr.vmem [resolvable:$true] %s18_s19 }
   0x4   :  { %s298_s20 = scalar_lea.vmem %s19_s19, 256  ;;  %p303_p1 = scmp.lt.s32.totalorder %s19_s19, %s19_s19 }
   0x5   :  { %p299_p0 = scmp.ne.s32.totalorder %s19_s19, %s298_s20  ;;  %p304_p2 = scmp.lt.s32.totalorder %s298_s20, %s298_s20 }
   0x7   :  { %p305_p3 = por %p304_p2, %p303_p1 }
   0x9   :  { %p306_p4 = pnand %p305_p3, %p299_p0 }
   0xb   :  { %309 = shalt.err (!%p306_p4)
}
   0xc   :  { %s357_s21 = smov 128   ;;  %s358_s22 = smov 8  }
   0xd   :  { %24 = dma.hbm_to_vmem [thread:$0]  %s419_s0, 256, %s19_s19, [#allocation3], %s357_s21, %s357_s21, %s358_s22  }
   0xe   :  { %s359_s25 = smov [#allocation5]  }
   0xf   :  { %s34_s26 = sshll.u32 %s359_s25, 4  ;;  %s35_s26 = int_to_ptr.vmem [resolvable:$true] %s34_s26 }
  0x10   :  { %s318_s27 = scalar_lea.vmem %s35_s26, 1024  ;;  %p323_p6 = scmp.lt.s32.totalorder %s35_s26, %s35_s26 }
  0x11   :  { %p319_p5 = scmp.ne.s32.totalorder %s35_s26, %s318_s27  ;;  %p324_p7 = scmp.lt.s32.totalorder %s318_s27, %s318_s27 }
  0x13   :  { %p325_p8 = por %p324_p7, %p323_p6 }
  0x15   :  { %p326_p9 = pnand %p325_p8, %p319_p5 }
  0x17   :  { %329 = shalt.err (!%p326_p9)
}
  0x18   :  { %s360_s28 = smov 64   ;;  %s361_s29 = smov 4  }
  0x19   :  { %40 = dma.hbm_to_vmem [thread:$0]  %s422_s3, 1024, %s35_s26, [#allocation6], %s360_s28, %s360_s28, %s361_s29  }
  0x1a   :  { %350 = dma.done.wait [#allocation3], 256  }
  0x1b   :  { %351 = vsyncadd [#allocation3], 4294967040 }
  0x1c   :  { %352 = dma.done.wait [#allocation6], 1024  }
  0x1d   :  { %353 = vsyncadd [#allocation6], 4294966272  ;;  %v50_v0 = vld [vmem:[#allocation2] sm:$0xff]  ;;  %v51_v1 = vld [vmem:[#allocation2 + $0x8] sm:$0xff]  ;;  %v362_v5 = vmov 0.0   ;;  %vm363_vm0 = vmmov 0  }
  0x1e   :  { %52 = vadd.xlane.f32.xlu0 %v50_v0  ;;  %v56_v2 = vmul.f32 %v50_v0, %v50_v0  ;;  %v57_v3 = vmul.f32 %v51_v1, %v51_v1  ;;  %v278_v4 = vld [vmem:[#allocation5 + $0x38] sm:$0xff]   ;;  %249 = vmatprep.subr.bf16.mxu0 %v362_v5  ;;  %v279_v6 = vld [vmem:[#allocation5 + $0x30] sm:$0xff]   ;;  %v280_v7 = vld [vmem:[#allocation5 + $0x28] sm:$0xff]  }
  0x1f   :  { %250 = vmatpush3.bf16.msra.mxu0 %v278_v4  ;;  %v281_v8 = vld [vmem:[#allocation5 + $0x20] sm:$0xff]   ;;  %265 = vmatprep.mubr.msk.bf16.mxu0 %vm363_vm0, %v362_v5  ;;  %v282_v9 = vld [vmem:[#allocation5 + $0x18] sm:$0xff]   ;;  %v283_v10 = vld [vmem:[#allocation5 + $0x10] sm:$0xff]  }
  0x20   :  { %58 = vadd.xlane.f32.xlu1 %v56_v2  ;;  %251 = vmatprep.subr.bf16.mxu0 %v362_v5  ;;  %v284_v11 = vld [vmem:[#allocation5 + $0x8] sm:$0xff]   ;;  %v285_v12 = vld [vmem:[#allocation5] sm:$0xff]   ;;  %v229_v30 = vld [vmem:[%s420_s1] ss:$0 sm:$0xff]  ;;  %s364_s1 = smov [#allocation7]  }
  0x21   :  { %v230_v35 = vld [vmem:[%s421_s2] ss:$0 sm:$0xff]  ;;  %s216_s11 = sshll.u32 %s364_s1, 4  ;;  %s217_s11 = int_to_ptr.vmem [resolvable:$true] %s216_s11 }
  0x22   :  { %54 = vadd.xlane.f32.xlu0 %v51_v1  ;;  %v231_v40 = vld [vmem:[%s423_s4] ss:$0 sm:$0xff]  ;;  %s330_s2 = scalar_lea.vmem %s217_s11, 256  ;;  %p335_p11 = scmp.lt.s32.totalorder %s217_s11, %s217_s11 }
  0x23   :  { %252 = vmatpush3.bf16.msra.mxu0 %v279_v6  ;;  %p331_p10 = scmp.ne.s32.totalorder %s217_s11, %s330_s2  ;;  %p336_p12 = scmp.lt.s32.totalorder %s330_s2, %s330_s2 }
  0x24   :  { %60 = vadd.xlane.f32.xlu1 %v57_v3  ;;  %253 = vmatprep.subr.bf16.mxu0 %v362_v5 }
  0x25   :  { %p337_p13 = por %p336_p12, %p335_p11 }
  0x27   :  { %254 = vmatpush3.bf16.msra.mxu0 %v280_v7  ;;  %p338_p0 = pnand %p337_p13, %p331_p10 }
  0x28   :  { %255 = vmatprep.subr.bf16.mxu0 %v362_v5 }
  0x2b   :  { %256 = vmatpush3.bf16.msra.mxu0 %v281_v8 }
  0x2c   :  { %257 = vmatprep.subr.bf16.mxu0 %v362_v5 }
  0x2f   :  { %258 = vmatpush3.bf16.msra.mxu0 %v282_v9 }
  0x30   :  { %259 = vmatprep.subr.bf16.mxu0 %v362_v5 }
  0x33   :  { %260 = vmatpush3.bf16.msra.mxu0 %v283_v10 }
  0x34   :  { %261 = vmatprep.subr.bf16.mxu0 %v362_v5 }
  0x37   :  { %262 = vmatpush3.bf16.msra.mxu0 %v284_v11 }
  0x38   :  { %263 = vmatprep.subr.bf16.mxu0 %v362_v5 }
  0x3b   :  { %264 = vmatpush3.bf16.msra.mxu0 %v285_v12 }
  0xa7   :  { %v53_v13 = vpop.xlane.xlu0 %52 }
  0xa8   :  { %v62_v14 = vmul.f32 0.03125, %v53_v13 }
  0xa9   :  { %v59_v15 = vpop.xlane.xlu1 %58 }
  0xaa   :  { %v66_v16 = vmul.f32 %v62_v14, %v62_v14  ;;  %v64_v17 = vmul.f32 0.03125, %v59_v15  ;;  %v74_v27 = vsub.f32 %v50_v0, %v62_v14 }
  0xab   :  { %v55_v18 = vpop.xlane.xlu0 %54 }
  0xac   :  { %v68_v19 = vsub.f32 %v64_v17, %v66_v16  ;;  %v63_v20 = vmul.f32 0.03125, %v55_v18 }
  0xad   :  { %v61_v21 = vpop.xlane.xlu1 %60 }
  0xae   :  { %v70_v22 = vadd.f32 1e-05, %v68_v19  ;;  %v67_v23 = vmul.f32 %v63_v20, %v63_v20  ;;  %v65_v24 = vmul.f32 0.03125, %v61_v21  ;;  %v75_v31 = vsub.f32 %v51_v1, %v63_v20 }
  0xb0   :  { %286 = vrsqrt.f32 %v70_v22  ;;  %v69_v25 = vsub.f32 %v65_v24, %v67_v23 }
  0xb2   :  { %v71_v26 = vadd.f32 1e-05, %v69_v25 }
  0xb4   :  { %288 = vrsqrt.f32 %v71_v26 }
  0xbd   :  { %v287_v28 = vpop.eup %286 }
  0xbe   :  { %v76_v29 = vmul.f32 %v287_v28, %v74_v27 }
  0xc0   :  { %v85_v34 = vmul.f32 %v229_v30, %v76_v29 }
  0xc1   :  { %v289_v32 = vpop.eup %288 }
  0xc2   :  { %v77_v33 = vmul.f32 %v289_v32, %v75_v31  ;;  %v94_v37 = vadd.f32 %v230_v35, %v85_v34 }
  0xc4   :  { %v86_v36 = vmul.f32 %v229_v30, %v77_v33 }
  0xc6   :  { %v95_v38 = vadd.f32 %v230_v35, %v86_v36 }
  0xc8   :  { %v96_v39 = vpack.c.bf16 %v95_v38, %v94_v37 }
  0xca   :  { %266 = vmatmul.mubr.bf16.vlgmr.msra.gmra.mxu0 %v96_v39 }
 0x18a   :  { %v202_v41 = vpop.f32.mrf.mxu0 }
 0x18b   :  { %v203_v42 = vadd.f32 %v231_v40, %v202_v41 }
 0x18c   :  { %v267_v43 = vpop.f32.mrf.mxu0 }
 0x18d   :  { %209 = vst [vmem:[#allocation7] sm:$0xff] %v203_v42 }
 0x18e   :  { %v205_v44 = vpop.f32.mrf.mxu0 }
 0x18f   :  { %v206_v45 = vadd.f32 %v231_v40, %v205_v44 }
 0x190   :  { %v268_v46 = vpop.f32.mrf.mxu0 }
 0x191   :  { %210 = vst [vmem:[#allocation7 + $0x8] sm:$0xff] %v206_v45 }
 0x192   :  { %341 = shalt.err (!%p338_p0)
}
 0x193   :  { %222 = dma.vmem_to_hbm [thread:$0]  %s217_s11, 256, %s424_s5, [#allocation4], %s357_s21, %s357_s21, %s358_s22  }
 0x194   :  { %354 = dma.done.wait [#allocation4], 256  }
 0x195   :  { %355 = vsyncadd [#allocation4], 4294967040 }
 0x196   :  { %226 = vsyncpa [#allocation3], 1 }
 0x197   :  { %227 = vsyncpa [#allocation6], 1 }
 0x198   :  { %228 = vsyncpa [#allocation4], 1 }

</bundles_post_ra>
